<compile_context>
chip_gen: v7x
topology: tpu7x:2x2x1
jax: 0.10.0
libtpu: 0.0.40
codegen_flags: <defaults>
</compile_context>

<pallas_src>
import functools

import jax
import jax.numpy as jnp
from jax import lax
from jax.experimental import pallas as pl
from jax.experimental.pallas import tpu as pltpu

_LANES = 128
_SUBLANES = 8
_ALIGN = _LANES * _SUBLANES                 # 1024 elems = one full f32 vreg of rows
_DEFAULT_MAX_TILE_ROWS = 6144               # 3 MiB per (rows, 128) f32 tile
_DEFAULT_MIN_KERNEL_ROWS = 256              # below ~32K elems, fused jnp is faster
_DEFAULT_VMEM_LIMIT_BYTES = 56 * 1024 * 1024  # < 64 MiB/TC on v7x, < 128 MiB v5e/v6e


def _rosenbrock_jnp(x, y, a, b):
    """Plain fused-elementwise Rosenbrock residual (fast path / tail path)."""
    d = a - x
    t = y - x * x
    return d * d + b * (t * t)


def _res_kernel(x_ref, y_ref, a_ref, b_ref, res_ref):
    """Elementwise residual on one lane-dense tile (VPU only, HBM-bound)."""
    x = x_ref[...]
    y = y_ref[...]
    d = a_ref[...] - x
    t = y - x * x
    res_ref[...] = d * d + b_ref[...] * (t * t)


def _mean_partials_kernel(x_ref, y_ref, a_ref, b_ref, part_ref, *,
                          valid_rows, tile_rows, need_mask):
    """Per-tile (8, 128) partial sums; grid axis is fully parallel (no accumulator)."""
    x = x_ref[...]
    y = y_ref[...]
    d = a_ref[...] - x
    t = y - x * x
    res = d * d + b_ref[...] * (t * t)
    if need_mask:
        # Last tile may extend past the valid rows; zero the out-of-bounds rows so
        # they contribute nothing to the sum (OOB input data is unspecified).
        valid = valid_rows - pl.program_id(0) * tile_rows
        row_id = lax.broadcasted_iota(jnp.int32, res.shape, 0)
        res = jnp.where(row_id < valid, res, 0.0)
    # (tile_rows, 128) -> (tile_rows//8, 8, 128) is a layout-preserving vreg regroup;
    # the axis-0 sum is plain vreg + vreg on the VPU (no XLU needed).
    part = jnp.sum(res.reshape(tile_rows // _SUBLANES, _SUBLANES, _LANES), axis=0)
    part_ref[...] = part[None]


def _round_up(x, m):
    return ((x + m - 1) // m) * m


def rosenbrock_forward(X, Y, a, b, average_over_funcs=False,
                       max_tile_rows=_DEFAULT_MAX_TILE_ROWS,
                       min_kernel_rows=_DEFAULT_MIN_KERNEL_ROWS,
                       vmem_limit_bytes=_DEFAULT_VMEM_LIMIT_BYTES):
    """X, Y, a, b: float32 arrays of shape (B, 1). Returns (B, 1) or a scalar mean."""
    B = X.shape[0]
    X = X.astype(jnp.float32)
    Y = Y.astype(jnp.float32)
    a = a.astype(jnp.float32)
    b = b.astype(jnp.float32)

    bulk = (B // _ALIGN) * _ALIGN          # 1024-aligned portion handled by the kernel
    rows = bulk // _LANES                  # always a multiple of 8
    tail = B - bulk

    # Small-batch fast path: launch + relayout overhead would dominate.
    if rows < max(min_kernel_rows, 1):
        res = _rosenbrock_jnp(X, Y, a, b)
        return jnp.mean(res) if average_over_funcs else res

    # Lane-dense bulk views: free reshape when B % 1024 == 0, one prefix slice otherwise.
    def bulk_view(v):
        return v.reshape(-1)[:bulk].reshape(rows, _LANES)

    xb, yb, ab, bb = bulk_view(X), bulk_view(Y), bulk_view(a), bulk_view(b)

    # Balanced tiling: num_tiles from the cap, then even tile_rows (multiple of 8).
    num_tiles = pl.cdiv(rows, max_tile_rows)
    tile_rows = _round_up(pl.cdiv(rows, num_tiles), _SUBLANES)
    need_mask = (rows % tile_rows) != 0    # last tile partially out of bounds

    tile_spec = pl.BlockSpec((tile_rows, _LANES), lambda i: (i, 0))
    compiler_params = pltpu.CompilerParams(
        dimension_semantics=("parallel",),
        vmem_limit_bytes=vmem_limit_bytes,
    )

    # <1024-element tail handled by fused jnp (cheaper than padding 4 full arrays).
    if tail:
        res_tail = _rosenbrock_jnp(X.reshape(-1)[bulk:], Y.reshape(-1)[bulk:],
                                   a.reshape(-1)[bulk:], b.reshape(-1)[bulk:])

    if average_over_funcs:
        partials = pl.pallas_call(
            functools.partial(_mean_partials_kernel, valid_rows=rows,
                              tile_rows=tile_rows, need_mask=need_mask),
            out_shape=jax.ShapeDtypeStruct((num_tiles, _SUBLANES, _LANES), jnp.float32),
            grid=(num_tiles,),
            in_specs=[tile_spec, tile_spec, tile_spec, tile_spec],
            out_specs=pl.BlockSpec((1, _SUBLANES, _LANES), lambda i: (i, 0, 0)),
            compiler_params=compiler_params,
        )(xb, yb, ab, bb)
        total = jnp.sum(partials)
        if tail:
            total = total + jnp.sum(res_tail)
        # mean over the ORIGINAL batch size B
        return total * jnp.float32(1.0 / B)

    res_bulk = pl.pallas_call(
        _res_kernel,
        out_shape=jax.ShapeDtypeStruct((rows, _LANES), jnp.float32),
        grid=(num_tiles,),
        in_specs=[tile_spec, tile_spec, tile_spec, tile_spec],
        out_specs=tile_spec,
        compiler_params=compiler_params,
    )(xb, yb, ab, bb)

    flat = res_bulk.reshape(-1)
    if tail:
        flat = jnp.concatenate([flat, res_tail])
    return flat.reshape(B, 1)


if __name__ == "__main__":
    key = jax.random.PRNGKey(0)

    def make_params(k, batch, stddev=1.0):
        # Mirrors RosenBrock.__init__ (use_cuda=False, canonical=False):
        #   X ~ N(0, stddev), Y ~ N(0, stddev), a ~ N(1, 1), b ~ N(100, 1)
        kx, ky, ka, kb = jax.random.split(k, 4)
        X = jax.random.normal(kx, (batch, 1), jnp.float32) * stddev
        Y = jax.random.normal(ky, (batch, 1), jnp.float32) * stddev
        a = jax.random.normal(ka, (batch, 1), jnp.float32) + 1.0
        b = jax.random.normal(kb, (batch, 1), jnp.float32) + 100.0
        return X, Y, a, b

    def ref_fn(X, Y, a, b):
        return (a - X) ** 2 + b * (Y - X * X) ** 2

    k1, k2, k3 = jax.random.split(key, 3)

    # 1) Module-default shape (batch=128): small-batch fast path.
    X, Y, a, b = make_params(k1, 128)
    ref = ref_fn(X, Y, a, b)
    res = jax.block_until_ready(rosenbrock_forward(X, Y, a, b))
    mres = jax.block_until_ready(
        rosenbrock_forward(X, Y, a, b, average_over_funcs=True))
    assert res.shape == (128, 1)
    assert jnp.allclose(res, ref, rtol=1e-5, atol=1e-5)
    assert jnp.allclose(mres, ref.mean(), rtol=1e-4, atol=1e-4)

    # 2) Pallas path, multi-tile pipelined grid: B=4096 -> 32 rows -> 4 tiles of 8 rows.
    X, Y, a, b = make_params(k2, 4096)
    ref = ref_fn(X, Y, a, b)
    res = jax.block_until_ready(
        rosenbrock_forward(X, Y, a, b, max_tile_rows=8, min_kernel_rows=1))
    mres = jax.block_until_ready(
        rosenbrock_forward(X, Y, a, b, average_over_funcs=True,
                           max_tile_rows=8, min_kernel_rows=1))
    assert res.shape == (4096, 1)
    assert jnp.allclose(res, ref, rtol=1e-5, atol=1e-5)
    assert jnp.allclose(mres, ref.mean(), rtol=1e-4, atol=1e-4)
    # Single-tile default-config kernel on the same data.
    res1 = jax.block_until_ready(rosenbrock_forward(X, Y, a, b, min_kernel_rows=1))
    assert jnp.allclose(res1, ref, rtol=1e-5, atol=1e-5)

    # 3) Ragged batch + partial last block + in-kernel mask:
    #    B=5200 -> bulk 5120 (40 rows) through the kernel, 80-element tail in jnp;
    #    max_tile_rows=16 -> 3 tiles of 16 rows, last tile half out-of-bounds.
    X, Y, a, b = make_params(k3, 5200)
    ref = ref_fn(X, Y, a, b)
    res = jax.block_until_ready(
        rosenbrock_forward(X, Y, a, b, max_tile_rows=16, min_kernel_rows=1))
    mres = jax.block_until_ready(
        rosenbrock_forward(X, Y, a, b, average_over_funcs=True,
                           max_tile_rows=16, min_kernel_rows=1))
    assert res.shape == (5200, 1)
    assert jnp.allclose(res, ref, rtol=1e-5, atol=1e-5)
    assert jnp.allclose(mres, ref.mean(), rtol=1e-4, atol=1e-4)

    print("KERNEL_OK")
</pallas_src>

<mosaic_0001>
module attributes {stable_mosaic.version = 11 : i64} {
  func.func @_res_kernel(%arg0: i32, %arg1: memref<8x128xf32, #tpu.memory_space<vmem>>, %arg2: memref<8x128xf32, #tpu.memory_space<vmem>>, %arg3: memref<8x128xf32, #tpu.memory_space<vmem>>, %arg4: memref<8x128xf32, #tpu.memory_space<vmem>>, %arg5: memref<8x128xf32, #tpu.memory_space<vmem>>) attributes {dimension_semantics = [#tpu.dimension_semantics<parallel>], iteration_bounds = array<i64: 4>, scalar_prefetch = 0 : i64, scratch_operands = 0 : i64, tpu.core_type = #tpu.core_type<tc>, window_params = [{transform_indices = @transform_0, window_bounds = array<i64: 8, 128>}, {transform_indices = @transform_1, window_bounds = array<i64: 8, 128>}, {transform_indices = @transform_2, window_bounds = array<i64: 8, 128>}, {transform_indices = @transform_3, window_bounds = array<i64: 8, 128>}, {transform_indices = @transform_4, window_bounds = array<i64: 8, 128>}]} {
    %c0 = arith.constant 0 : index
    %c0_0 = arith.constant 0 : index
    %0 = vector.load %arg1[%c0, %c0_0] : memref<8x128xf32, #tpu.memory_space<vmem>>, vector<8x128xf32>
    %c0_1 = arith.constant 0 : index
    %c0_2 = arith.constant 0 : index
    %1 = vector.load %arg2[%c0_1, %c0_2] : memref<8x128xf32, #tpu.memory_space<vmem>>, vector<8x128xf32>
    %c0_3 = arith.constant 0 : index
    %c0_4 = arith.constant 0 : index
    %2 = vector.load %arg3[%c0_3, %c0_4] : memref<8x128xf32, #tpu.memory_space<vmem>>, vector<8x128xf32>
    %3 = arith.subf %2, %0 : vector<8x128xf32>
    %4 = arith.mulf %0, %0 : vector<8x128xf32>
    %5 = arith.subf %1, %4 : vector<8x128xf32>
    %6 = arith.mulf %3, %3 : vector<8x128xf32>
    %c0_5 = arith.constant 0 : index
    %c0_6 = arith.constant 0 : index
    %7 = vector.load %arg4[%c0_5, %c0_6] : memref<8x128xf32, #tpu.memory_space<vmem>>, vector<8x128xf32>
    %8 = arith.mulf %5, %5 : vector<8x128xf32>
    %9 = arith.mulf %7, %8 : vector<8x128xf32>
    %10 = arith.addf %6, %9 : vector<8x128xf32>
    %c0_7 = arith.constant 0 : index
    %c0_8 = arith.constant 0 : index
    %11 = vector.load %arg5[%c0_7, %c0_8] : memref<8x128xf32, #tpu.memory_space<vmem>>, vector<8x128xf32>
    tpu.vector_store %arg5[%c0_7, %c0_8], %10 {strides = array<i32>} : memref<8x128xf32, #tpu.memory_space<vmem>>, vector<8x128xf32>,
    return
  }
  func.func @transform_0(%arg0: i32) -> (i32, i32) {
    %c0_i32 = arith.constant 0 : i32
    %c0_i32_0 = arith.constant 0 : i32
    return %arg0, %c0_i32 : i32, i32
  }
  func.func @transform_1(%arg0: i32) -> (i32, i32) {
    %c0_i32 = arith.constant 0 : i32
    %c0_i32_0 = arith.constant 0 : i32
    return %arg0, %c0_i32 : i32, i32
  }
  func.func @transform_2(%arg0: i32) -> (i32, i32) {
    %c0_i32 = arith.constant 0 : i32
    %c0_i32_0 = arith.constant 0 : i32
    return %arg0, %c0_i32 : i32, i32
  }
  func.func @transform_3(%arg0: i32) -> (i32, i32) {
    %c0_i32 = arith.constant 0 : i32
    %c0_i32_0 = arith.constant 0 : i32
    return %arg0, %c0_i32 : i32, i32
  }
  func.func @transform_4(%arg0: i32) -> (i32, i32) {
    %c0_i32 = arith.constant 0 : i32
    %c0_i32_0 = arith.constant 0 : i32
    return %arg0, %c0_i32 : i32, i32
  }
}

</mosaic_0001>

<bundles_post_ra>
// kernel: tpu_custom_call.1
= control target key start
LH: loop header
LB: loop body
LE: loop exit
PB: predicated region body
PF: predicated region fallthrough
CT: control target
= control target key end

     0   :  { %s1055_s0 = inlined_call_operand.hbm [shape: f32[32,128], index: 0, kind: input, shape index: {}]   ;;  %s1056_s1 = inlined_call_operand.hbm [shape: f32[32,128], index: 1, kind: input, shape index: {}]   ;;  %s1057_s2 = inlined_call_operand.hbm [shape: f32[32,128], index: 2, kind: input, shape index: {}]   ;;  %s1058_s3 = inlined_call_operand.hbm [shape: f32[32,128], index: 3, kind: input, shape index: {}]   ;;  %s1059_s4 = inlined_call_operand.hbm [shape: f32[32,128], index: 4, kind: output, shape index: {}]  }
   0x1   :  { %1065 = sst [smem:[#allocation17_spill]] %s1056_s1 }
   0x2   :  { %9 = vsyncpa [#allocation3], 0 }
   0x3   :  { %11 = vsyncpa [#allocation3 + $0x1], 0 }
   0x4   :  { %12 = vsyncpa [#allocation6], 0 }
   0x5   :  { %14 = vsyncpa [#allocation6 + $0x1], 0 }
   0x6   :  { %15 = vsyncpa [#allocation9], 0 }
   0x7   :  { %17 = vsyncpa [#allocation9 + $0x1], 0 }
   0x8   :  { %18 = vsyncpa [#allocation4], 0 }
   0x9   :  { %20 = vsyncpa [#allocation4 + $0x1], 0  ;;  %s791_s15 = smov 0   ;;  %s793_s16 = smov 0  }
   0xa   :  { %s795_s17 = smov 0   ;;  %s797_s18 = smov 0  }
   0xb LB: > { %1066 = sst [smem:[#allocation15_spill]] %s755_s17  ;;  %s812_s19 = sadd.s32 4294967295, %s759_s18   ;;  %s759_s18 = sphi %s797_s18, %s1087_s18   ;;  %s755_s17 = sphi %s795_s17, %s1084_s17   ;;  %s751_s16 = sphi %s793_s16, %s1086_s16   ;;  %s747_s15 = sphi %s791_s15, %s1085_s15  }
   0xc   : > { %s483_s20 = sadd.s32 4294967294, %s759_s18   ;;  %s816_s21 = sadd.s32 1, %s759_s18  }
   0xd   : > { %s33_s22 = sadd.s32 1, %s755_s17  ;;  %s30_s23 = ssub.s32 %s759_s18, %s816_s21 }
   0xe   : > { %p40_p0 = scmp.ne.s32.totalorder %s755_s17, %s751_s16  ;;  %p31_p1 = scmp.eq.s32.totalorder %s30_s23, 0 }
   0xf   : > { %p41_p2 = scmp.eq.s32.totalorder %s759_s18, 0  ;;  %p46_p3 = scmp.ne.s32.totalorder %s751_s16, %s747_s15 }
  0x10   : > { %p47_p4 = scmp.eq.s32.totalorder %s812_s19, 0  ;;  %p148_p7 = scmp.eq.s32.totalorder %s812_s19, 3 }
  0x11   : > { %s828_s24 = scalar_select %p31_p1, %s755_s17, %s33_s22  }
  0x12   : > { %p42_p5 = por %p41_p2, %p40_p0  ;;  %p830_p6 = por %p47_p4, %p46_p3 }
  0x13   : > { %1067 = sst [smem:[#allocation16_spill]] %s828_s24  ;;  %p154_p8 = scmp.eq.s32.totalorder %s483_s20, 3 }
  0x14   : > { %s1068_s25 = scalar_select %p830_p6, 1, 0 }
  0x15   : > { %p531_p9 = scmp.lt.s32.totalorder %s759_s18, 4  ;;  %p836_p10 = por %p148_p7, %p40_p0 }
  0x16   : > { %p840_p11 = por %p154_p8, %p46_p3  ;;  %s845_s28 = sand.u32 1, %s755_s17  }
  0x17   : > { %s1069_s26 = scalar_select %p836_p10, 1, 0 }
  0x18   : > { %s1070_s27 = scalar_select %p840_p11, 1, 0 }
  0x19   : > { %s848_s29 = sshll.u32 %s759_s18, 7  ;;  %s851_s30 = sshll.u32 %s845_s28, 3 }
  0x1a   : > { %p853_p12 = pnand %p531_p9, %p42_p5  ;;  %s192_s6 = sand.u32 1, %s759_s18  }
  0x1b   : > { %s1072_s1 = sld [smem:[#allocation17_spill]]  ;;  %s196_s10 = scalar_lea.vmem [#allocation5], %s851_s30 }
  0x1c   : > { %s1071_s5 = scalar_select %p853_p12, 1, 0 }
  0x1d   : > { %s203_s11 = sshll.u32 %s196_s10, 4  ;;  %s868_s12 = scalar_lea.sflag [#allocation6], %s192_s6  ;;  %s865_s11 = int_to_ptr.vmem [resolvable:$true] %s203_s11 }
  0x1e   : > { %p874_p1 = pneg %p853_p12 }
  0x21   : > { %s862_s9 = scalar_lea.hbm %s1072_s1, %s848_s29  ;;  %s570_s23 = scalar_lea.hbm %s1072_s1, 512 }
  0x22   : > { %s565_s13 = scalar_lea.hbm %s862_s9, 128  ;;  %p571_p4 = scmp.lt.u32.totalorder %s862_s9, %s1072_s1 }
  0x23   : > { %p566_p0 = scmp.ne.s32.totalorder %s862_s9, %s565_s13  ;;  %p572_p5 = scmp.lt.u32.totalorder %s570_s23, %s565_s13 }
  0x24   : > { %p574_p8 = scmp.lt.u32.totalorder %s565_s13, %s862_s9 }
  0x25   : > { %p568_p2 = pnand %p874_p1, %p566_p0  ;;  %p573_p7 = por %p572_p5, %p571_p4 }
  0x27   : > { %p569_p3 = pneg %p568_p2  ;;  %p575_p9 = por %p574_p8, %p573_p7 }
  0x29   : > { %p576_p13 = pnand %p575_p9, %p569_p3 }
  0x2b   : > { %579 = shalt.err (!%p576_p13)
}
  0x2c   : > { %s580_s6 = scalar_lea.vmem %s865_s11, 128  ;;  %s761_s10 = smov [#allocation5]  }
  0x2d   : > { %p581_p0 = scmp.ne.s32.totalorder %s865_s11, %s580_s6  ;;  %s585_s20 = sshll.u32 %s761_s10, 4  ;;  %s586_s20 = int_to_ptr.vmem [resolvable:$false] %s585_s20 }
  0x2e   : > { %s587_s22 = scalar_lea.vmem %s586_s20, 256  ;;  %p588_p10 = scmp.lt.s32.totalorder %s865_s11, %s586_s20 }
  0x2f   : > { %p583_p2 = pnand %p581_p0, %p874_p1  ;;  %p589_p6 = scmp.lt.s32.totalorder %s587_s22, %s580_s6 }
  0x31   : > { %p584_p11 = pneg %p583_p2  ;;  %p590_p4 = por %p589_p6, %p588_p10 }
  0x33   : > { %p591_p5 = pnand %p590_p4, %p584_p11 }
  0x35   : > { %594 = shalt.err (!%p591_p5)
}
  0x36   : > { %520 = dma.hbm_to_vmem [thread:$0]  (!%p853_p12), %s862_s9, 128, %s865_s11, %s868_s12  }
  0x37   : > { %p244_p13 = scmp.lt.s32.totalorder %s759_s18, 5  ;;  %s903_s7 = scalar_lea.hbm %s1055_s0, %s848_s29 }
  0x38   : > { %p1074_p6 = scmp.ge.s32.totalorder %s759_s18, 1  ;;  %s178_s6 = scalar_lea.vmem [#allocation2], %s851_s30 }
  0x39   : > { %s185_s10 = sshll.u32 %s178_s6, 4  ;;  %s175_s20 = scalar_lea.sflag [#allocation3], %s845_s28  ;;  %s186_s10 = int_to_ptr.vmem [resolvable:$true] %s185_s10 }
  0x3a   : > { %p907_p10 = pnand %p1074_p6, %p244_p13  ;;  %s595_s9 = scalar_lea.hbm %s903_s7, 128 }
  0x3b   : > { %p596_p11 = scmp.ne.s32.totalorder %s903_s7, %s595_s9  ;;  %s600_s13 = scalar_lea.hbm %s1055_s0, 512 }
  0x3c   : > { %s1075_s8 = scalar_select %p907_p10, 1, 0 }
  0x3d   : > { %p598_p3 = pnand %p596_p11, %p874_p1  ;;  %p601_p8 = scmp.lt.u32.totalorder %s903_s7, %s1055_s0 }
  0x3e   : > { %p602_p9 = scmp.lt.u32.totalorder %s600_s13, %s595_s9  ;;  %p604_p2 = scmp.lt.u32.totalorder %s595_s9, %s903_s7 }
  0x3f   : > { %p599_p7 = pneg %p598_p3 }
  0x40   : > { %p603_p0 = por %p602_p9, %p601_p8 }
  0x42   : > { %p605_p4 = por %p604_p2, %p603_p0 }
  0x44   : > { %p606_p5 = pnand %p605_p4, %p599_p7 }
  0x46   : > { %609 = shalt.err (!%p606_p5)
}
  0x47   : > { %s610_s6 = scalar_lea.vmem %s186_s10, 128  ;;  %s762_s24 = smov [#allocation2]  }
  0x48   : > { %p611_p13 = scmp.ne.s32.totalorder %s186_s10, %s610_s6  ;;  %s615_s17 = sshll.u32 %s762_s24, 4  ;;  %s616_s17 = int_to_ptr.vmem [resolvable:$false] %s615_s17 }
  0x49   : > { %s617_s11 = scalar_lea.vmem %s616_s17, 256  ;;  %p618_p3 = scmp.lt.s32.totalorder %s186_s10, %s616_s17 }
  0x4a   : > { %p613_p6 = pnand %p611_p13, %p874_p1  ;;  %p619_p10 = scmp.lt.s32.totalorder %s617_s11, %s610_s6 }
  0x4c   : > { %p614_p11 = pneg %p613_p6  ;;  %p620_p12 = por %p619_p10, %p618_p3 }
  0x4e   : > { %p621_p8 = pnand %p620_p12, %p614_p11 }
  0x50   : > { %624 = shalt.err (!%p621_p8)
}
  0x51   : > { %p1076_p9 = scmp.ne.s32.totalorder %s1071_s5, 0  ;;  %s934_s22 = scalar_lea.hbm %s1057_s2, %s848_s29 }
  0x52   : > { %s214_s17 = scalar_lea.vmem [#allocation7], %s851_s30  ;;  %s625_s13 = scalar_lea.hbm %s934_s22, 128 }
  0x53   : > { %517 = dma.hbm_to_vmem [thread:$0]  (!%p1076_p9), %s903_s7, 128, %s186_s10, %s175_s20  }
  0x54   : > { %s221_s24 = sshll.u32 %s214_s17, 4  ;;  %p626_p12 = scmp.ne.s32.totalorder %s934_s22, %s625_s13  ;;  %s222_s24 = int_to_ptr.vmem [resolvable:$true] %s221_s24 }
  0x55   : > { %s630_s7 = scalar_lea.hbm %s1057_s2, 512  ;;  %p631_p0 = scmp.lt.u32.totalorder %s934_s22, %s1057_s2 }
  0x56   : > { %p628_p10 = pnand %p626_p12, %p874_p1  ;;  %p632_p2 = scmp.lt.u32.totalorder %s630_s7, %s625_s13 }
  0x57   : > { %p634_p5 = scmp.lt.u32.totalorder %s625_s13, %s934_s22 }
  0x58   : > { %p629_p7 = pneg %p628_p10  ;;  %p633_p4 = por %p632_p2, %p631_p0 }
  0x5a   : > { %p635_p13 = por %p634_p5, %p633_p4 }
  0x5c   : > { %p636_p6 = pnand %p635_p13, %p629_p7 }
  0x5e   : > { %639 = shalt.err (!%p636_p6)
}
  0x5f   : > { %s640_s11 = scalar_lea.vmem %s222_s24, 128  ;;  %s763_s1 = smov [#allocation7]  }
  0x60   : > { %p641_p11 = scmp.ne.s32.totalorder %s222_s24, %s640_s11  ;;  %s645_s9 = sshll.u32 %s763_s1, 4  ;;  %s646_s9 = int_to_ptr.vmem [resolvable:$false] %s645_s9 }
  0x61   : > { %s647_s17 = scalar_lea.vmem %s646_s9, 256  ;;  %p648_p12 = scmp.lt.s32.totalorder %s222_s24, %s646_s9 }
  0x62   : > { %p643_p3 = pnand %p641_p11, %p874_p1  ;;  %p649_p10 = scmp.lt.s32.totalorder %s647_s17, %s640_s11 }
  0x64   : > { %p644_p8 = pneg %p643_p3  ;;  %p650_p9 = por %p649_p10, %p648_p12 }
  0x66   : > { %p651_p0 = pnand %p650_p9, %p644_p8 }
  0x68   : > { %654 = shalt.err (!%p651_p0)
}
  0x69   : > { %p1077_p2 = scmp.ne.s32.totalorder %s1071_s5, 0  ;;  %s959_s6 = scalar_lea.hbm %s1058_s3, %s848_s29 }
  0x6a   : > { %s232_s7 = scalar_lea.vmem [#allocation8], %s851_s30  ;;  %s229_s20 = scalar_lea.sflag [#allocation9], %s845_s28 }
  0x6b   : > { %523 = dma.hbm_to_vmem [thread:$0]  (!%p1077_p2), %s934_s22, 128, %s222_s24, %s868_s12  }
  0x6c   : > { %s239_s10 = sshll.u32 %s232_s7, 4  ;;  %s655_s11 = scalar_lea.hbm %s959_s6, 128  ;;  %s240_s10 = int_to_ptr.vmem [resolvable:$true] %s239_s10 }
  0x6d   : > { %p656_p9 = scmp.ne.s32.totalorder %s959_s6, %s655_s11  ;;  %s660_s22 = scalar_lea.hbm %s1058_s3, 512 }
  0x6e   : > { %p661_p5 = scmp.lt.u32.totalorder %s959_s6, %s1058_s3  ;;  %p662_p13 = scmp.lt.u32.totalorder %s660_s22, %s655_s11 }
  0x6f   : > { %p658_p7 = pnand %p656_p9, %p874_p1  ;;  %p664_p11 = scmp.lt.u32.totalorder %s655_s11, %s959_s6 }
  0x70   : > { %p663_p6 = por %p662_p13, %p661_p5 }
  0x71   : > { %p659_p4 = pneg %p658_p7 }
  0x72   : > { %p665_p3 = por %p664_p11, %p663_p6 }
  0x74   : > { %p666_p8 = pnand %p665_p3, %p659_p4 }
  0x76   : > { %669 = shalt.err (!%p666_p8)
}
  0x77   : > { %s670_s28 = scalar_lea.vmem %s240_s10, 128  ;;  %s764_s30 = smov [#allocation8]  }
  0x78   : > { %p671_p12 = scmp.ne.s32.totalorder %s240_s10, %s670_s28  ;;  %s675_s9 = sshll.u32 %s764_s30, 4  ;;  %s676_s9 = int_to_ptr.vmem [resolvable:$false] %s675_s9 }
  0x79   : > { %s677_s17 = scalar_lea.vmem %s676_s9, 256  ;;  %p678_p9 = scmp.lt.s32.totalorder %s240_s10, %s676_s9 }
  0x7a   : > { %p673_p10 = pnand %p671_p12, %p874_p1  ;;  %p679_p7 = scmp.lt.s32.totalorder %s677_s17, %s670_s28 }
  0x7c   : > { %p674_p0 = pneg %p673_p10  ;;  %p680_p2 = por %p679_p7, %p678_p9 }
  0x7e   : > { %p681_p5 = pnand %p680_p2, %p674_p0 }
  0x80   : > { %684 = shalt.err (!%p681_p5)
}
  0x81   : > { %p1078_p13 = scmp.ne.s32.totalorder %s1071_s5, 0  ;;  %p1079_p4 = scmp.ne.s32.totalorder %s1075_s8, 0 }
  0x82   : > { %s983_s14 = sand.u32 (!%p1079_p4), 1, %s751_s16   ;;  %p1080_p1 = scmp.ne.s32.totalorder (!%p1079_p4), %s1068_s25, 0 }
  0x83   : > { %526 = dma.hbm_to_vmem [thread:$0]  (!%p1078_p13), %s959_s6, 128, %s240_s10, %s229_s20  }
  0x84   : > { %248 = sbr.rel (%p1079_p4) target bundleno = 172 (0xac), region = 36  ;;  %s986_s13 = sshll.u32 (!%p1079_p4), %s983_s14, 3 }
  0x85   : > { %s251_s23 = scalar_lea.sflag (!%p1079_p4), [#allocation3], %s983_s14  ;;  %s254_s7 = scalar_lea.vmem (!%p1079_p4), [#allocation2], %s986_s13 }
  0x8b   : > { %730 = dma.done.wait (%p1080_p1), %s251_s23, 128  }
  0x8c   : > { %732 = vsyncadd (%p1080_p1), %s251_s23, 4294967168  ;;  %s259_s5 = sand.u32 1, %s812_s19   ;;  %s263_s6 = scalar_lea.vmem [#allocation5], %s986_s13 }
  0x8d   : > { %s260_s8 = scalar_lea.sflag [#allocation6], %s259_s5 }
  0x8e   : > { %734 = dma.done.wait (%p1080_p1), %s260_s8, 256  }
  0x8f   : > { %736 = vsyncadd (%p1080_p1), %s260_s8, 4294967040  ;;  %s272_s10 = scalar_lea.vmem [#allocation7], %s986_s13  ;;  %s278_s20 = scalar_lea.sflag [#allocation9], %s983_s14 }
  0x90   : > { %s281_s11 = scalar_lea.vmem [#allocation8], %s986_s13 }
  0x91   : > { %738 = dma.done.wait (%p1080_p1), %s278_s20, 128  }
  0x92   : > { %740 = vsyncadd (%p1080_p1), %s278_s20, 4294967168  ;;  %v321_v0 = vld [vmem:[%s254_s7] sm:$0xff]  ;;  %v322_v1 = vld [vmem:[%s263_s6] sm:$0xff]  ;;  %s320_s1 = scalar_lea.vmem [#allocation10], %s986_s13  ;;  %s501_s22 = sshll.u32 %s812_s19, 7 }
  0x93   : > { %v323_v2 = vld [vmem:[%s272_s10] sm:$0xff]  ;;  %v325_v4 = vmul.f32 %v321_v0, %v321_v0  ;;  %v328_v6 = vld [vmem:[%s281_s11] sm:$0xff]  ;;  %s347_s12 = sshll.u32 %s320_s1, 4  ;;  %s1014_s29 = scalar_lea.hbm %s1059_s4, %s501_s22  ;;  %s1009_s12 = int_to_ptr.vmem [resolvable:$true] %s347_s12 }
  0x94   : > { %v324_v3 = vsub.f32 %v323_v2, %v321_v0  ;;  %s334_s28 = scalar_lea.sflag [#allocation4], %s983_s14  ;;  %s685_s30 = scalar_lea.vmem %s1009_s12, 128 }
  0x95   : > { %v326_v5 = vsub.f32 %v322_v1, %v325_v4  ;;  %p686_p2 = scmp.ne.s32.totalorder %s1009_s12, %s685_s30  ;;  %p1081_p6 = scmp.ne.s32.totalorder %s1069_s26, 0 }
  0x96   : > { %v327_v7 = vmul.f32 %v324_v3, %v324_v3  ;;  %s765_s19 = smov [#allocation10]  }
  0x97   : > { %v329_v8 = vmul.f32 %v326_v5, %v326_v5  ;;  %p687_p11 = pnand %p686_p2, %p1081_p6  ;;  %s689_s9 = sshll.u32 %s765_s19, 4  ;;  %s690_s9 = int_to_ptr.vmem [resolvable:$false] %s689_s9 }
  0x98   : > { %s691_s17 = scalar_lea.vmem %s690_s9, 256  ;;  %p692_p8 = scmp.lt.s32.totalorder %s1009_s12, %s690_s9 }
  0x99   : > { %v330_v9 = vmul.f32 %v329_v8, %v328_v6  ;;  %p688_p3 = pneg %p687_p11  ;;  %p693_p12 = scmp.lt.s32.totalorder %s691_s17, %s685_s30 }
  0x9b   : > { %v331_v10 = vadd.f32 %v330_v9, %v327_v7  ;;  %p694_p10 = por %p693_p12, %p692_p8 }
  0x9d   : > { %332 = vst [vmem:[%s320_s1] sm:$0xff] %v331_v10  ;;  %p695_p0 = pnand %p694_p10, %p688_p3 }
  0x9f   : > { %698 = shalt.err (!%p695_p0)
}
  0xa0   : > { %s699_s14 = scalar_lea.hbm %s1014_s29, 128  ;;  %s703_s7 = scalar_lea.hbm %s1059_s4, 512 }
  0xa1   : > { %p700_p9 = scmp.ne.s32.totalorder %s1014_s29, %s699_s14  ;;  %p704_p13 = scmp.lt.u32.totalorder %s1014_s29, %s1059_s4 }
  0xa2   : > { %p705_p4 = scmp.lt.u32.totalorder %s703_s7, %s699_s14  ;;  %p707_p2 = scmp.lt.u32.totalorder %s699_s14, %s1014_s29 }
  0xa3   : > { %p701_p7 = pnand %p700_p9, %p1081_p6 }
  0xa4   : > { %p706_p1 = por %p705_p4, %p704_p13 }
  0xa5   : > { %p702_p5 = pneg %p701_p7 }
  0xa6   : > { %p708_p11 = por %p707_p2, %p706_p1 }
  0xa8   : > { %p709_p3 = pnand %p708_p11, %p702_p5 }
  0xaa   : > { %712 = shalt.err (!%p709_p3)
}
  0xab   : > { %512 = dma.vmem_to_hbm [thread:$0]  (%p1081_p6), %s1009_s12, 128, %s1014_s29, %s334_s28  }
  0xac PF: > { %p532_p8 = scmp.ge.s32.totalorder %s759_s18, 2  ;;  %s359_s6 = sand.u32 1, %s747_s15  }
  0xad   : > { %p1082_p12 = scmp.ne.s32.totalorder %s1070_s27, 0  ;;  %s360_s10 = scalar_lea.sflag [#allocation4], %s359_s6 }
  0xaf   : > { %p528_p10 = pnand %p532_p8, %p1082_p12 }
  0xb1   : > { %742 = dma.done.wait (!%p528_p10), %s360_s10, 128  }
  0xb2   : > { %744 = vsyncadd (!%p528_p10), %s360_s10, 4294967168  ;;  %s1083_s20 = sld [smem:[#allocation15_spill]]  ;;  %s1084_s17 = sld [smem:[#allocation16_spill]] }
  0xb3   : > { %p23_p0 = scmp.ge.s32.totalorder %s816_s21, 6   ;;  %s1085_s15 = smov %s751_s16 }
  0xb4   : > { %s1087_s18 = smov %s816_s21 }
  0xb5   :  { %25 = sbr.rel (!%p23_p0) target bundleno = 11 (0xb), region = 118 }
  0xb8   : > { %s1086_s16 = smov %s1083_s20 }
  0xbc   :  { %365 = vsyncpa [#allocation3], 1 }
  0xbd   :  { %367 = vsyncpa [#allocation3 + $0x1], 1 }
  0xbe   :  { %368 = vsyncpa [#allocation6], 1 }
  0xbf   :  { %370 = vsyncpa [#allocation6 + $0x1], 1 }
  0xc0   :  { %371 = vsyncpa [#allocation9], 1 }
  0xc1   :  { %373 = vsyncpa [#allocation9 + $0x1], 1 }
  0xc2   :  { %374 = vsyncpa [#allocation4], 1 }
  0xc3   :  { %376 = vsyncpa [#allocation4 + $0x1], 1 }

</bundles_post_ra>
